<compile_context>
chip_gen: v6e
topology: v6e:2x2x1
jax: 0.10.0
libtpu: 0.0.40
codegen_flags: <defaults>
</compile_context>

<pallas_src>
import jax
import jax.numpy as jnp
from jax.experimental import pallas as pl
from jax.experimental.pallas import tpu as pltpu


# ------------------------------ fused kernel ------------------------------- #

def _cnn1l_fused_kernel(xt_ref, ex_ref, wc_ref, bcf_ref, w1_ref, w2_ref,
                        b2_ref, o_ref):
    """Whole CNN1L forward; all refs are whole-array VMEM residents.

    xt_ref : (B, KH*KW*Cin, n_lane)  tap-shifted, lane-padded input copies
    ex_ref : (B, 128)                [time, station, 1, 0-pad]
    wc_ref : (Co, KH*KW*Cin)         conv weight, tap-major / channel-minor
    bcf_ref: (1, Co*n_lane)          conv bias pre-broadcast to flat layout
    w1_ref : (Co*n_lane + 128, nf1)  [conv block ; time ; station ; b1 ; 0]
    w2_ref : (nf1, n_out), b2_ref: (1, n_out)
    """
    B = xt_ref.shape[0]
    Co = wc_ref.shape[0]
    n_lane = xt_ref.shape[2]

    # ---- conv2d: ONE K=36 MXU matmul per batch ----
    rows = []
    for b in range(B):                                   # tiny B -> static unroll
        conv_b = jnp.dot(wc_ref[...], xt_ref[b],
                         preferred_element_type=jnp.float32)        # (Co, n_lane)
        # Unavoidable conv->fc1 relayout: (Co, n_lane) -> (1, Co*n_lane).
        # Static row slices + a single lane-aligned concat (~8 KiB).
        rows.append(jnp.concatenate([conv_b[c:c + 1, :] for c in range(Co)],
                                    axis=1))                         # (1, Co*n_lane)
    act_conv = jnp.concatenate(rows, axis=0)                         # (B, Co*n_lane)

    # ---- bias + ReLU once, over the whole batch-stacked tile ----
    act_conv = jnp.maximum(act_conv + bcf_ref[...], 0.0)

    # ---- fc1 as ONE matmul (time/station/b1 folded into w1 via ones column) --
    act = jnp.concatenate([act_conv, ex_ref[...]], axis=1)           # (B, Co*n_lane+128)
    h = jnp.maximum(jnp.dot(act, w1_ref[...],
                            preferred_element_type=jnp.float32), 0.0)

    # ---- fc2 ----
    out = jnp.dot(h, w2_ref[...], preferred_element_type=jnp.float32) + b2_ref[...]
    o_ref[...] = out.astype(o_ref.dtype)


# ------------------------------- wrapper ------------------------------------ #

@jax.jit
def cnn1l_forward(params, x, time_features, station_features):
    """Semantics of CNN1L.forward with useSTI=True, useTimeData=True, stride=1."""
    w_conv, b_conv, w1, b1, w2, b2 = (
        params["w_conv"], params["b_conv"],
        params["w1"], params["b1"], params["w2"], params["b2"])

    B, Cin, H, W = x.shape
    Co, _, KH, KW = w_conv.shape
    Ho, Wo = H - KH + 1, W - KW + 1          # stride=1, VALID (asserted at call site)
    n_conv = Ho * W                          # lane-dense conv row length (incl. wrap cols)
    n_lane = pl.cdiv(n_conv, 128) * 128      # pad 224 -> 256 (whole vregs, no lane tails)
    flat = Co * Ho * Wo
    nf1 = w1.shape[1]
    n_out = w2.shape[1]
    n_time = time_features.shape[1]
    n_stat = station_features.shape[1]
    n_extra = n_time + n_stat + 1            # +1 ones column carries b1
    n_extra_pad = 128

    # ---- tiny trace-time re-layouts (all host/XLA side) ----
    # 1) tap-shifted copies of x: xt[b, (kh*KW+kw)*Cin + c, j] = x_flat[b, c, kh*W+kw + j]
    wpad = (KH - 1) * W + (KW - 1) + n_conv
    xflat = jnp.pad(x.reshape(B, Cin, H * W), ((0, 0), (0, 0), (0, wpad - H * W)))
    taps = [jax.lax.slice_in_dim(xflat, kh * W + kw, kh * W + kw + n_conv, axis=2)
            for kh in range(KH) for kw in range(KW)]
    xt = jnp.concatenate(taps, axis=1)                                   # (B, KH*KW*Cin, n_conv)
    xt = jnp.pad(xt, ((0, 0), (0, 0), (0, n_lane - n_conv)))             # (B, 36, n_lane)

    # 2) conv weight as (Co, KH*KW*Cin), tap-major / channel-minor (matches xt)
    wc = w_conv.transpose(0, 2, 3, 1).reshape(Co, KH * KW * Cin)

    # 3) conv bias pre-broadcast to the flattened activation layout
    bc_flat = jnp.repeat(b_conv, n_lane).reshape(1, Co * n_lane)

    # 4) fc1 weight: conv block zero-padded so wrap-garbage / pad lanes contribute 0;
    #    then [time ; station ; b1-row ; zero pad] appended.
    w1c = w1[:flat].reshape(Co, Ho, Wo, nf1)
    w1c = jnp.pad(w1c, ((0, 0), (0, 0), (0, W - Wo), (0, 0))).reshape(Co, Ho * W, nf1)
    w1c = jnp.pad(w1c, ((0, 0), (0, n_lane - Ho * W), (0, 0))).reshape(Co * n_lane, nf1)
    w1_extra = jnp.concatenate([w1[flat:], b1.reshape(1, nf1)], axis=0)  # (n_extra, nf1)
    w1_extra = jnp.pad(w1_extra, ((0, n_extra_pad - n_extra), (0, 0)))
    w1_all = jnp.concatenate([w1c, w1_extra], axis=0)                    # (Co*n_lane+128, nf1)

    # 5) extra activation block [time, station, 1, 0...0]
    extra = jnp.concatenate(
        [time_features, station_features, jnp.ones((B, 1), x.dtype)], axis=1)
    extra = jnp.pad(extra, ((0, 0), (0, n_extra_pad - n_extra)))         # (B, 128)

    b2row = b2.reshape(1, n_out)

    operands = (xt, extra, wc, bc_flat, w1_all, w2, b2row)
    flops = 2 * B * (KH * KW * Cin * Co * n_lane
                     + (Co * n_lane + n_extra_pad) * nf1 + nf1 * n_out)
    bytes_accessed = 4 * (sum(int(a.size) for a in operands) + B * n_out)

    return pl.pallas_call(
        _cnn1l_fused_kernel,
        out_shape=jax.ShapeDtypeStruct((B, n_out), jnp.float32),
        in_specs=[pl.BlockSpec(memory_space=pltpu.MemorySpace.VMEM)] * len(operands),
        out_specs=pl.BlockSpec(memory_space=pltpu.MemorySpace.VMEM),
        cost_estimate=pl.CostEstimate(flops=flops, transcendentals=0,
                                      bytes_accessed=bytes_accessed),
    )(*operands)


# ---------------------------------- main ------------------------------------ #

if __name__ == "__main__":
    # Module hyper-parameters (small, consistent with CNN1L.__init__)
    filter_conv1 = 8          # conv output channels
    grid_conv1 = 3            # conv kernel size
    stride = 1
    assert stride == 1        # kernel/wrapper hard-code stride=1, VALID padding
    n_fc1 = 32
    n_parameters = 2
    n_time_invariant_parameters = 1
    n_grid = 16
    prediction_times = [1, 2, 3]
    n_predictions = len(prediction_times)
    n_station_features = 3
    n_time_features = 5

    Cin = n_parameters + 1 + n_time_invariant_parameters          # 4
    conv_out = (n_grid - grid_conv1) // stride + 1                 # 14
    flat = filter_conv1 * conv_out * conv_out                      # 1568
    fc1_in = flat + n_station_features + n_time_features           # 1576
    B = 2

    key = jax.random.PRNGKey(0)
    ks = jax.random.split(key, 9)
    x = jax.random.normal(ks[0], (B, Cin, n_grid, n_grid), jnp.float32)
    time_features = jax.random.normal(ks[1], (B, n_time_features), jnp.float32)
    station_features = jax.random.normal(ks[2], (B, n_station_features), jnp.float32)

    params = {
        "w_conv": 0.1 * jax.random.normal(
            ks[3], (filter_conv1, Cin, grid_conv1, grid_conv1), jnp.float32),
        "b_conv": 0.1 * jax.random.normal(ks[4], (filter_conv1,), jnp.float32),
        "w1": 0.05 * jax.random.normal(ks[5], (fc1_in, n_fc1), jnp.float32),
        "b1": 0.05 * jax.random.normal(ks[6], (n_fc1,), jnp.float32).reshape(1, n_fc1),
        "w2": 0.1 * jax.random.normal(ks[7], (n_fc1, n_predictions), jnp.float32),
        "b2": 0.1 * jax.random.normal(ks[8], (n_predictions,), jnp.float32).reshape(1, n_predictions),
    }

    out = cnn1l_forward(params, x, time_features, station_features)
    out = jax.block_until_ready(out)
    assert out.shape == (B, n_predictions)

    # Pure-JAX reference (conv+relu -> flatten -> concat -> fc1+relu -> fc2).
    conv_ref = jax.lax.conv_general_dilated(
        x, params["w_conv"], window_strides=(1, 1), padding="VALID",
        dimension_numbers=("NCHW", "OIHW", "NCHW")) + params["b_conv"].reshape(1, -1, 1, 1)
    h = jnp.maximum(conv_ref, 0.0).reshape(B, -1)
    h = jnp.concatenate([h, time_features, station_features], axis=1)
    h = jnp.maximum(h @ params["w1"] + params["b1"], 0.0)
    ref = h @ params["w2"] + params["b2"]
    assert jnp.allclose(out, ref, atol=1e-4, rtol=1e-4)

    print("KERNEL_OK")
</pallas_src>

<mosaic_0001>
module attributes {stable_mosaic.version = 11 : i64} {
  func.func @_cnn1l_fused_kernel(%arg0: memref<2x36x256xf32, #tpu.memory_space<vmem>>, %arg1: memref<2x128xf32, #tpu.memory_space<vmem>>, %arg2: memref<8x36xf32, #tpu.memory_space<vmem>>, %arg3: memref<1x2048xf32, #tpu.memory_space<vmem>>, %arg4: memref<2176x32xf32, #tpu.memory_space<vmem>>, %arg5: memref<32x3xf32, #tpu.memory_space<vmem>>, %arg6: memref<1x3xf32, #tpu.memory_space<vmem>>, %arg7: memref<2x3xf32, #tpu.memory_space<vmem>>) attributes {dimension_semantics = [], scalar_prefetch = 0 : i64, scratch_operands = 0 : i64, tpu.core_type = #tpu.core_type<tc>} {
    %c0 = arith.constant 0 : index
    %c0_0 = arith.constant 0 : index
    %0 = vector.load %arg2[%c0, %c0_0] : memref<8x36xf32, #tpu.memory_space<vmem>>, vector<8x36xf32>
    %c0_1 = arith.constant 0 : index
    %c0_2 = arith.constant 0 : index
    %c0_3 = arith.constant 0 : index
    %1 = vector.load %arg0[%c0_1, %c0_2, %c0_3] : memref<2x36x256xf32, #tpu.memory_space<vmem>>, vector<1x36x256xf32>
    %2 = vector.shape_cast %1 : vector<1x36x256xf32> to vector<36x256xf32>
    %cst = arith.constant dense<0.000000e+00> : vector<8x256xf32>
    %3 = tpu.matmul %0, %2, %cst {dimension_numbers = #tpu.dot_dimension_numbers<[1], [0], [0], [1], [0, 0, 1, 1], [], []>} : vector<8x36xf32>, vector<36x256xf32>, vector<8x256xf32> -> vector<8x256xf32>
    %4 = vector.extract_strided_slice %3 {offsets = [0, 0], sizes = [1, 256], strides = [1, 1]} : vector<8x256xf32> to vector<1x256xf32>
    %5 = vector.extract_strided_slice %3 {offsets = [1, 0], sizes = [1, 256], strides = [1, 1]} : vector<8x256xf32> to vector<1x256xf32>
    %6 = vector.extract_strided_slice %3 {offsets = [2, 0], sizes = [1, 256], strides = [1, 1]} : vector<8x256xf32> to vector<1x256xf32>
    %7 = vector.extract_strided_slice %3 {offsets = [3, 0], sizes = [1, 256], strides = [1, 1]} : vector<8x256xf32> to vector<1x256xf32>
    %8 = vector.extract_strided_slice %3 {offsets = [4, 0], sizes = [1, 256], strides = [1, 1]} : vector<8x256xf32> to vector<1x256xf32>
    %9 = vector.extract_strided_slice %3 {offsets = [5, 0], sizes = [1, 256], strides = [1, 1]} : vector<8x256xf32> to vector<1x256xf32>
    %10 = vector.extract_strided_slice %3 {offsets = [6, 0], sizes = [1, 256], strides = [1, 1]} : vector<8x256xf32> to vector<1x256xf32>
    %11 = vector.extract_strided_slice %3 {offsets = [7, 0], sizes = [1, 256], strides = [1, 1]} : vector<8x256xf32> to vector<1x256xf32>
    %12 = tpu.concatenate %4, %5, %6, %7, %8, %9, %10, %11 in 1 : vector<1x256xf32>, vector<1x256xf32>, vector<1x256xf32>, vector<1x256xf32>, vector<1x256xf32>, vector<1x256xf32>, vector<1x256xf32>, vector<1x256xf32> -> vector<1x2048xf32>
    %c0_4 = arith.constant 0 : index
    %c0_5 = arith.constant 0 : index
    %13 = vector.load %arg2[%c0_4, %c0_5] : memref<8x36xf32, #tpu.memory_space<vmem>>, vector<8x36xf32>
    %c1 = arith.constant 1 : index
    %c0_6 = arith.constant 0 : index
    %c0_7 = arith.constant 0 : index
    %14 = vector.load %arg0[%c1, %c0_6, %c0_7] : memref<2x36x256xf32, #tpu.memory_space<vmem>>, vector<1x36x256xf32>
    %15 = vector.shape_cast %14 : vector<1x36x256xf32> to vector<36x256xf32>
    %cst_8 = arith.constant dense<0.000000e+00> : vector<8x256xf32>
    %16 = tpu.matmul %13, %15, %cst_8 {dimension_numbers = #tpu.dot_dimension_numbers<[1], [0], [0], [1], [0, 0, 1, 1], [], []>} : vector<8x36xf32>, vector<36x256xf32>, vector<8x256xf32> -> vector<8x256xf32>
    %17 = vector.extract_strided_slice %16 {offsets = [0, 0], sizes = [1, 256], strides = [1, 1]} : vector<8x256xf32> to vector<1x256xf32>
    %18 = vector.extract_strided_slice %16 {offsets = [1, 0], sizes = [1, 256], strides = [1, 1]} : vector<8x256xf32> to vector<1x256xf32>
    %19 = vector.extract_strided_slice %16 {offsets = [2, 0], sizes = [1, 256], strides = [1, 1]} : vector<8x256xf32> to vector<1x256xf32>
    %20 = vector.extract_strided_slice %16 {offsets = [3, 0], sizes = [1, 256], strides = [1, 1]} : vector<8x256xf32> to vector<1x256xf32>
    %21 = vector.extract_strided_slice %16 {offsets = [4, 0], sizes = [1, 256], strides = [1, 1]} : vector<8x256xf32> to vector<1x256xf32>
    %22 = vector.extract_strided_slice %16 {offsets = [5, 0], sizes = [1, 256], strides = [1, 1]} : vector<8x256xf32> to vector<1x256xf32>
    %23 = vector.extract_strided_slice %16 {offsets = [6, 0], sizes = [1, 256], strides = [1, 1]} : vector<8x256xf32> to vector<1x256xf32>
    %24 = vector.extract_strided_slice %16 {offsets = [7, 0], sizes = [1, 256], strides = [1, 1]} : vector<8x256xf32> to vector<1x256xf32>
    %25 = tpu.concatenate %17, %18, %19, %20, %21, %22, %23, %24 in 1 : vector<1x256xf32>, vector<1x256xf32>, vector<1x256xf32>, vector<1x256xf32>, vector<1x256xf32>, vector<1x256xf32>, vector<1x256xf32>, vector<1x256xf32> -> vector<1x2048xf32>
    %26 = tpu.concatenate %12, %25 in 0 : vector<1x2048xf32>, vector<1x2048xf32> -> vector<2x2048xf32>
    %c0_9 = arith.constant 0 : index
    %c0_10 = arith.constant 0 : index
    %27 = vector.load %arg3[%c0_9, %c0_10] : memref<1x2048xf32, #tpu.memory_space<vmem>>, vector<1x2048xf32>
    %28 = vector.broadcast %27 : vector<1x2048xf32> to vector<2x2048xf32>
    %29 = arith.addf %26, %28 : vector<2x2048xf32>
    %cst_11 = arith.constant 0.000000e+00 : f32
    %30 = vector.broadcast %cst_11 : f32 to vector<2x2048xf32>
    %31 = arith.maximumf %29, %30 : vector<2x2048xf32>
    %c0_12 = arith.constant 0 : index
    %c0_13 = arith.constant 0 : index
    %32 = vector.load %arg1[%c0_12, %c0_13] : memref<2x128xf32, #tpu.memory_space<vmem>>, vector<2x128xf32>
    %33 = tpu.concatenate %31, %32 in 1 : vector<2x2048xf32>, vector<2x128xf32> -> vector<2x2176xf32>
    %c0_14 = arith.constant 0 : index
    %c0_15 = arith.constant 0 : index
    %34 = vector.load %arg4[%c0_14, %c0_15] : memref<2176x32xf32, #tpu.memory_space<vmem>>, vector<2176x32xf32>
    %cst_16 = arith.constant dense<0.000000e+00> : vector<2x32xf32>
    %35 = tpu.matmul %33, %34, %cst_16 {dimension_numbers = #tpu.dot_dimension_numbers<[1], [0], [0], [1], [0, 0, 1, 1], [], []>} : vector<2x2176xf32>, vector<2176x32xf32>, vector<2x32xf32> -> vector<2x32xf32>
    %cst_17 = arith.constant 0.000000e+00 : f32
    %36 = vector.broadcast %cst_17 : f32 to vector<2x32xf32>
    %37 = arith.maximumf %35, %36 : vector<2x32xf32>
    %c0_18 = arith.constant 0 : index
    %c0_19 = arith.constant 0 : index
    %38 = vector.load %arg5[%c0_18, %c0_19] : memref<32x3xf32, #tpu.memory_space<vmem>>, vector<32x3xf32>
    %cst_20 = arith.constant dense<0.000000e+00> : vector<2x3xf32>
    %39 = tpu.matmul %37, %38, %cst_20 {dimension_numbers = #tpu.dot_dimension_numbers<[1], [0], [0], [1], [0, 0, 1, 1], [], []>} : vector<2x32xf32>, vector<32x3xf32>, vector<2x3xf32> -> vector<2x3xf32>
    %c0_21 = arith.constant 0 : index
    %c0_22 = arith.constant 0 : index
    %40 = vector.load %arg6[%c0_21, %c0_22] : memref<1x3xf32, #tpu.memory_space<vmem>>, vector<1x3xf32>
    %41 = vector.broadcast %40 : vector<1x3xf32> to vector<2x3xf32>
    %42 = arith.addf %39, %41 : vector<2x3xf32>
    %c0_23 = arith.constant 0 : index
    %c0_24 = arith.constant 0 : index
    %43 = vector.load %arg7[%c0_23, %c0_24] : memref<2x3xf32, #tpu.memory_space<vmem>>, vector<2x3xf32>
    tpu.vector_store %arg7[%c0_23, %c0_24], %42 {strides = array<i32>} : memref<2x3xf32, #tpu.memory_space<vmem>>, vector<2x3xf32>,
    return
  }
}

</mosaic_0001>

<bundles_post_ra>
// kernel: cnn1l_forward.1
= control target key start
LH: loop header
LB: loop body
LE: loop exit
PB: predicated region body
PF: predicated region fallthrough
CT: control target
= control target key end

     0   :  { %vm42_vm0 = vcmask 1043456   ;;  %v1825_v5 = vmov 0.0   ;;  %vm38_vm1 = vcmask 293888   ;;  %s2928_s0 = inlined_call_operand.vmem [shape: f32[2,36,256], index: 0, kind: input, shape index: {}]   ;;  %s2929_s1 = inlined_call_operand.vmem [shape: f32[2,128], index: 1, kind: input, shape index: {}]   ;;  %s2930_s2 = inlined_call_operand.vmem [shape: f32[8,36], index: 2, kind: input, shape index: {}]   ;;  %s2931_s3 = inlined_call_operand.vmem [shape: f32[1,2048], index: 3, kind: input, shape index: {}]   ;;  %s2932_s4 = inlined_call_operand.vmem [shape: f32[2176,32], index: 4, kind: input, shape index: {}]   ;;  %s2933_s5 = inlined_call_operand.vmem [shape: f32[32,3], index: 5, kind: input, shape index: {}]   ;;  %s2934_s6 = inlined_call_operand.vmem [shape: f32[1,3], index: 6, kind: input, shape index: {}]   ;;  %s2935_s7 = inlined_call_operand.hbm [shape: f32[2,3], index: 7, kind: output, shape index: {}]  }
   0x1   :  { %v37_v0 = vld [vmem:[%s2928_s0 + $0x48] sm:$0xf]  ;;  %v36_v1 = vld [vmem:[%s2928_s0 + $0x40] sm:$0xf]  ;;  %v35_v2 = vld [vmem:[%s2928_s0 + $0x38] sm:$0xff]  ;;  %113 = vmatprep.mubr.f32.mxu1 %v1825_v5 }
   0x2   :  { %1422 = vmatprep.subr.msk.mxu1 %vm42_vm0, %v37_v0  ;;  %v34_v3 = vld [vmem:[%s2928_s0 + $0x30] sm:$0xff]  ;;  %v33_v4 = vld [vmem:[%s2928_s0 + $0x28] sm:$0xff]  ;;  %v32_v6 = vld [vmem:[%s2928_s0 + $0x20] sm:$0xff] }
   0x3   :  { %1423 = vmatpush1.msk.msra.mxu1 %vm42_vm0, %v36_v1  ;;  %v31_v7 = vld [vmem:[%s2928_s0 + $0x18] sm:$0xff]  ;;  %v30_v8 = vld [vmem:[%s2928_s0 + $0x10] sm:$0xff]  ;;  %v29_v9 = vld [vmem:[%s2928_s0 + $0x8] sm:$0xff] }
   0x4   :  { %73 = vmatprep.subr.mxu1 %v35_v2  ;;  %v28_v10 = vld [vmem:[%s2928_s0] sm:$0xff]  ;;  %v449_v11 = vld [vmem:[%s2932_s4 + $0xf8] sm:$0xff]  ;;  %v1433_v15 = vld [vmem:[%s2928_s0 + $0x90] sm:$0xf] }
   0x5   :  { %74 = vmatpush1.msra.mxu1 %v34_v3  ;;  %v27_v12 = vld [vmem:[%s2930_s2] sm:$0xff]  ;;  %v1434_v13 = vld [vmem:[%s2928_s0 + $0x98] sm:$0xf]  ;;  %1452 = vmatprep.subr.mxu0 %v449_v11  ;;  %v448_v16 = vld [vmem:[%s2932_s4 + $0xf0] sm:$0xff] }
   0x6   :  { %75 = vmatprep.subr.mxu1 %v33_v4  ;;  %v433_v14 = vld [vmem:[%s2932_s4 + $0x78] sm:$0xff]  ;;  %v1432_v17 = vld [vmem:[%s2928_s0 + $0x88] sm:$0xff]  ;;  %v432_v18 = vld [vmem:[%s2932_s4 + $0x70] sm:$0xff] }
   0x7   :  { %76 = vmatpush1.msra.mxu1 %v32_v6  ;;  %1453 = vmatpush3.msra.mxu0 %v433_v14  ;;  %v1431_v19 = vld [vmem:[%s2928_s0 + $0x80] sm:$0xff]  ;;  %v447_v20 = vld [vmem:[%s2932_s4 + $0xe8] sm:$0xff]  ;;  %v1430_v21 = vld [vmem:[%s2928_s0 + $0x78] sm:$0xff] }
   0x8   :  { %77 = vmatprep.subr.mxu1 %v31_v7  ;;  %1454 = vmatprep.subr.mxu0 %v448_v16  ;;  %v431_v22 = vld [vmem:[%s2932_s4 + $0x68] sm:$0xff]  ;;  %v1429_v23 = vld [vmem:[%s2928_s0 + $0x70] sm:$0xff]  ;;  %v446_v24 = vld [vmem:[%s2932_s4 + $0xe0] sm:$0xff] }
   0x9   :  { %78 = vmatpush1.msra.mxu1 %v30_v8  ;;  %1455 = vmatpush3.msra.mxu0 %v432_v18  ;;  %v1428_v25 = vld [vmem:[%s2928_s0 + $0x68] sm:$0xff]  ;;  %v430_v26 = vld [vmem:[%s2932_s4 + $0x60] sm:$0xff]  ;;  %v445_v28 = vld [vmem:[%s2932_s4 + $0xd8] sm:$0xff] }
   0xa   :  { %79 = vmatprep.subr.mxu1 %v29_v9  ;;  %1456 = vmatprep.subr.mxu0 %v447_v20  ;;  %v1427_v27 = vld [vmem:[%s2928_s0 + $0x60] sm:$0xff] }
   0xb   :  { %80 = vmatpush1.msra.mxu1 %v28_v10  ;;  %1457 = vmatpush3.msra.mxu0 %v431_v22 }
   0xc   :  { %1424 = vmatmul.mubr.msk.f32.vlgmr.msra.gmra.mxu1 %vm38_vm1, %v27_v12  ;;  %1435 = vmatprep.subr.msk.mxu1 %vm42_vm0, %v1434_v13 }
   0xd   :  { %1436 = vmatpush1.msk.msra.mxu1 %vm42_vm0, %v1433_v15  ;;  %231 = vmatprep.mubr.f32.mxu1 %v1825_v5 }
   0xe   :  { %191 = vmatprep.subr.mxu1 %v1432_v17 }
   0xf   :  { %192 = vmatpush1.msra.mxu1 %v1431_v19 }
  0x10   :  { %193 = vmatprep.subr.mxu1 %v1430_v21 }
  0x11   :  { %12 = vsyncpa [#allocation3], 0  ;;  %194 = vmatpush1.msra.mxu1 %v1429_v23  ;;  %v1426_v29 = vld [vmem:[%s2928_s0 + $0x58] sm:$0xff]  ;;  %1458 = vmatprep.subr.mxu0 %v446_v24  ;;  %v1425_v31 = vld [vmem:[%s2928_s0 + $0x50] sm:$0xff]  ;;  %v305_v17 = vlaneseq  ;;  %vm284_vm2 = vcmask 1040384   ;;  %vm1826_vm3 = vmmov 0  }
  0x12   :  { %v429_v30 = vld [vmem:[%s2932_s4 + $0x58] sm:$0xff]  ;;  %195 = vmatprep.subr.mxu1 %v1428_v25  ;;  %1459 = vmatpush3.msra.mxu0 %v430_v26  ;;  %v444_v32 = vld [vmem:[%s2932_s4 + $0xd0] sm:$0xff]  ;;  %v479_v38 = vld [vmem:[%s2932_s4 + $0x1e8] sm:$0xff]  ;;  %vm1332_vm4 = vcmask 261120   ;;  %s1827_s10 = smov [#allocation2]   ;;  %vm1406_vm5 = vcmask 17408  }
  0x13   :  { %196 = vmatpush1.msra.mxu1 %v1427_v27  ;;  %v481_v33 = vld [vmem:[%s2932_s4 + $0x1f8] sm:$0xff]  ;;  %1460 = vmatprep.subr.mxu0 %v445_v28  ;;  %v428_v35 = vld [vmem:[%s2932_s4 + $0x50] sm:$0xff]  ;;  %v463_v39 = vld [vmem:[%s2932_s4 + $0x168] sm:$0xff]  ;;  %v2128_v23 = vshrl.u32 %v305_v17, 7  ;;  %s1414_s11 = sshll.u32 %s1827_s10, 4  ;;  %s1415_s11 = int_to_ptr.vmem [resolvable:$true] %s1414_s11 }
  0x14   :  { %197 = vmatprep.subr.mxu1 %v1426_v29  ;;  %v465_v34 = vld [vmem:[%s2932_s4 + $0x178] sm:$0xff]  ;;  %1461 = vmatpush3.msra.mxu0 %v429_v30  ;;  %v480_v36 = vld [vmem:[%s2932_s4 + $0x1f0] sm:$0xff]  ;;  %v478_v40 = vld [vmem:[%s2932_s4 + $0x1e0] sm:$0xff]  ;;  %s1803_s12 = scalar_lea.vmem %s1415_s11, 32  ;;  %p1808_p1 = scmp.lt.s32.totalorder %s1415_s11, %s1415_s11 }
  0x15   :  { %198 = vmatpush1.msra.mxu1 %v1425_v31  ;;  %1462 = vmatprep.subr.mxu0 %v444_v32  ;;  %v464_v37 = vld [vmem:[%s2932_s4 + $0x170] sm:$0xff]  ;;  %v462_v41 = vld [vmem:[%s2932_s4 + $0x160] sm:$0xff]  ;;  %v477_v42 = vld [vmem:[%s2932_s4 + $0x1d8] sm:$0xff]  ;;  %v323_v26 = vsub.s32 4, %v2128_v23  ;;  %v331_v29 = vsub.s32 6, %v2128_v23  ;;  %p1804_p0 = scmp.ne.s32.totalorder %s1415_s11, %s1803_s12  ;;  %p1809_p2 = scmp.lt.s32.totalorder %s1803_s12, %s1803_s12 }
  0x16   :  { %1437 = vmatmul.mubr.msk.f32.vlgmr.msra.gmra.mxu1 %vm38_vm1, %v27_v12  ;;  %1487 = vmatprep.subr.mxu1 %v481_v33  ;;  %v461_v43 = vld [vmem:[%s2932_s4 + $0x158] sm:$0xff]  ;;  %v476_v44 = vld [vmem:[%s2932_s4 + $0x1d0] sm:$0xff]  ;;  %v475_v46 = vld [vmem:[%s2932_s4 + $0x1c8] sm:$0xff]  ;;  %v315_v33 = vsub.s32 2, %v2128_v23 }
  0x17   :  { %1488 = vmatpush3.msra.mxu1 %v465_v34  ;;  %1463 = vmatpush3.msra.mxu0 %v428_v35  ;;  %v460_v45 = vld [vmem:[%s2932_s4 + $0x150] sm:$0xff]  ;;  %v459_v47 = vld [vmem:[%s2932_s4 + $0x148] sm:$0xff]  ;;  %v474_v49 = vld [vmem:[%s2932_s4 + $0x1c0] sm:$0xff]  ;;  %v319_v35 = vsub.s32 3, %v2128_v23  ;;  %p1810_p3 = por %p1809_p2, %p1808_p1 }
  0x18   :  { %1489 = vmatprep.subr.mxu1 %v480_v36  ;;  %v443_v48 = vld [vmem:[%s2932_s4 + $0xc8] sm:$0xff]  ;;  %v458_v51 = vld [vmem:[%s2932_s4 + $0x140] sm:$0xff]  ;;  %v473_v53 = vld [vmem:[%s2932_s4 + $0x1b8] sm:$0xff]  ;;  %v311_v36 = vsub.s32 1, %v2128_v23 }
  0x19   :  { %1490 = vmatpush3.msra.mxu1 %v464_v37  ;;  %1464 = vmatprep.subr.mxu0 %v443_v48  ;;  %v427_v50 = vld [vmem:[%s2932_s4 + $0x48] sm:$0xff]  ;;  %v442_v52 = vld [vmem:[%s2932_s4 + $0xc0] sm:$0xff]  ;;  %v457_v55 = vld [vmem:[%s2932_s4 + $0x138] sm:$0xff]  ;;  %v307_v37 = vsub.s32 0, %v2128_v23  ;;  %p1811_p4 = pnand %p1810_p3, %p1804_p0 }
  0x1a   :  { %1491 = vmatprep.subr.mxu1 %v479_v38  ;;  %1465 = vmatpush3.msra.mxu0 %v427_v50  ;;  %v426_v54 = vld [vmem:[%s2932_s4 + $0x40] sm:$0xff]  ;;  %v441_v56 = vld [vmem:[%s2932_s4 + $0xb8] sm:$0xff]  ;;  %v472_v57 = vld [vmem:[%s2932_s4 + $0x1b0] sm:$0xff]  ;;  %v335_v38 = vsub.s32 7, %v2128_v23 }
  0x1b   :  { %1492 = vmatpush3.msra.mxu1 %v463_v39  ;;  %1466 = vmatprep.subr.mxu0 %v442_v52  ;;  %v425_v58 = vld [vmem:[%s2932_s4 + $0x38] sm:$0xff]  ;;  %v456_v59 = vld [vmem:[%s2932_s4 + $0x130] sm:$0xff]  ;;  %v471_v61 = vld [vmem:[%s2932_s4 + $0x1a8] sm:$0xff] }
  0x1c   :  { %1493 = vmatprep.subr.mxu1 %v478_v40  ;;  %1467 = vmatpush3.msra.mxu0 %v426_v54  ;;  %v440_v60 = vld [vmem:[%s2932_s4 + $0xb0] sm:$0xff]  ;;  %v455_v63 = vld [vmem:[%s2932_s4 + $0x128] sm:$0xff]  ;;  %v470_v1 = vld [vmem:[%s2932_s4 + $0x1a0] sm:$0xff]  ;;  %v327_v40 = vsub.s32 5, %v2128_v23 }
  0x1d   :  { %1494 = vmatpush3.msra.mxu1 %v462_v41  ;;  %1468 = vmatprep.subr.mxu0 %v441_v56  ;;  %v424_v62 = vld [vmem:[%s2932_s4 + $0x30] sm:$0xff]  ;;  %v439_v0 = vld [vmem:[%s2932_s4 + $0xa8] sm:$0xff]  ;;  %v454_v3 = vld [vmem:[%s2932_s4 + $0x120] sm:$0xff] }
  0x1e   :  { %1495 = vmatprep.subr.mxu1 %v477_v42  ;;  %1469 = vmatpush3.msra.mxu0 %v425_v58  ;;  %v423_v2 = vld [vmem:[%s2932_s4 + $0x28] sm:$0xff]  ;;  %v438_v4 = vld [vmem:[%s2932_s4 + $0xa0] sm:$0xff]  ;;  %v469_v6 = vld [vmem:[%s2932_s4 + $0x198] sm:$0xff] }
  0x1f   :  { %1496 = vmatpush3.msra.mxu1 %v461_v43  ;;  %1470 = vmatprep.subr.mxu0 %v440_v60  ;;  %v422_v7 = vld [vmem:[%s2932_s4 + $0x20] sm:$0xff]  ;;  %v453_v8 = vld [vmem:[%s2932_s4 + $0x118] sm:$0xff]  ;;  %v468_v10 = vld [vmem:[%s2932_s4 + $0x190] sm:$0xff] }
  0x20   :  { %1497 = vmatprep.subr.mxu1 %v476_v44  ;;  %1471 = vmatpush3.msra.mxu0 %v424_v62  ;;  %v437_v9 = vld [vmem:[%s2932_s4 + $0x98] sm:$0xff]  ;;  %v452_v12 = vld [vmem:[%s2932_s4 + $0x110] sm:$0xff]  ;;  %v467_v14 = vld [vmem:[%s2932_s4 + $0x188] sm:$0xff] }
  0x21   :  { %1498 = vmatpush3.msra.mxu1 %v460_v45  ;;  %1472 = vmatprep.subr.mxu0 %v439_v0  ;;  %v421_v11 = vld [vmem:[%s2932_s4 + $0x18] sm:$0xff]  ;;  %v436_v13 = vld [vmem:[%s2932_s4 + $0x90] sm:$0xff]  ;;  %v451_v16 = vld [vmem:[%s2932_s4 + $0x108] sm:$0xff] }
  0x22   :  { %1499 = vmatprep.subr.mxu1 %v475_v46  ;;  %1473 = vmatpush3.msra.mxu0 %v423_v2  ;;  %v420_v15 = vld [vmem:[%s2932_s4 + $0x10] sm:$0xff]  ;;  %v435_v18 = vld [vmem:[%s2932_s4 + $0x88] sm:$0xff]  ;;  %v466_v19 = vld [vmem:[%s2932_s4 + $0x180] sm:$0xff] }
  0x23   :  { %1500 = vmatpush3.msra.mxu1 %v459_v47  ;;  %1474 = vmatprep.subr.mxu0 %v438_v4  ;;  %v419_v20 = vld [vmem:[%s2932_s4 + $0x8] sm:$0xff]  ;;  %v450_v21 = vld [vmem:[%s2932_s4 + $0x100] sm:$0xff]  ;;  %v545_v24 = vld [vmem:[%s2932_s4 + $0x3f8] sm:$0xff] }
  0x24   :  { %1501 = vmatprep.subr.mxu1 %v474_v49  ;;  %1475 = vmatpush3.msra.mxu0 %v422_v7  ;;  %v434_v22 = vld [vmem:[%s2932_s4 + $0x80] sm:$0xff]  ;;  %v513_v27 = vld [vmem:[%s2932_s4 + $0x2f8] sm:$0xff]  ;;  %v2143_v28 = vld [vmem:[%s2931_s3 + $0x8] sm:$0xff] }
  0x25   :  { %1502 = vmatpush3.msra.mxu1 %v458_v51  ;;  %1476 = vmatprep.subr.mxu0 %v437_v9  ;;  %v418_v25 = vld [vmem:[%s2932_s4] sm:$0xff]  ;;  %v2149_v30 = vrot.slane %v2143_v28, %v331_v29  ;;  %v2154_v31 = vrot.slane %v2143_v28, %v323_v26 }
  0x26   :  { %1503 = vmatprep.subr.mxu1 %v473_v53  ;;  %1477 = vmatpush3.msra.mxu0 %v421_v11  ;;  %v2162_v34 = vld [vmem:[%s2931_s3] sm:$0xff] }
  0x27   :  { %1504 = vmatpush3.msra.mxu1 %v457_v55  ;;  %1478 = vmatprep.subr.mxu0 %v436_v13  ;;  %v316_v42 = vrot.slane %v2162_v34, %v315_v33  ;;  %v320_v44 = vrot.slane %v2162_v34, %v319_v35  ;;  %v312_v45 = vrot.slane %v2162_v34, %v311_v36  ;;  %v498_v23 = vld [vmem:[%s2932_s4 + $0x280] sm:$0xff] }
  0x28   :  { %1505 = vmatprep.subr.mxu1 %v472_v57  ;;  %1479 = vmatpush3.msra.mxu0 %v420_v15  ;;  %v308_v46 = vrot.slane %v2162_v34, %v307_v37  ;;  %v336_v49 = vrot.slane %v2162_v34, %v335_v38  ;;  %v328_v54 = vrot.slane %v2162_v34, %v327_v40  ;;  %v544_v15 = vld [vmem:[%s2932_s4 + $0x3f0] sm:$0xff] }
  0x29   :  { %1506 = vmatpush3.msra.mxu1 %v456_v59  ;;  %1480 = vmatprep.subr.mxu0 %v435_v18  ;;  %v348_v55 = vrot.slane %v2143_v28, %v315_v33  ;;  %v368_v13 = vrot.slane %v2143_v28, %v335_v38 }
  0x2a   :  { %1507 = vmatprep.subr.mxu1 %v471_v61  ;;  %1481 = vmatpush3.msra.mxu0 %v419_v20  ;;  %v528_v20 = vld [vmem:[%s2932_s4 + $0x370] sm:$0xff] }
  0x2b   :  { %1508 = vmatpush3.msra.mxu1 %v455_v63  ;;  %1482 = vmatprep.subr.mxu0 %v434_v22  ;;  %v340_v22 = vrot.slane %v2143_v28, %v307_v37  ;;  %v512_v37 = vld [vmem:[%s2932_s4 + $0x2f0] sm:$0xff] }
  0x2c   :  { %1509 = vmatprep.subr.mxu1 %v470_v1  ;;  %1483 = vmatpush3.msra.mxu0 %v418_v25 }
  0x2d   :  { %1510 = vmatpush3.msra.mxu1 %v454_v3  ;;  %1522 = vmatprep.subr.mxu0 %v513_v27  ;;  %v497_v27 = vld [vmem:[%s2932_s4 + $0x278] sm:$0xff] }
  0x2e   :  { %1511 = vmatprep.subr.mxu1 %v469_v6 }
  0x2f   :  { %1512 = vmatpush3.msra.mxu1 %v453_v8 }
  0x30   :  { %1513 = vmatprep.subr.mxu1 %v468_v10  ;;  %v529_v10 = vld [vmem:[%s2932_s4 + $0x378] sm:$0xff] }
  0x31   :  { %1514 = vmatpush3.msra.mxu1 %v452_v12 }
  0x32   :  { %1515 = vmatprep.subr.mxu1 %v467_v14 }
  0x33   :  { %1516 = vmatpush3.msra.mxu1 %v451_v16 }
  0x34   :  { %1517 = vmatprep.subr.mxu1 %v466_v19 }
  0x35   :  { %1518 = vmatpush3.msra.mxu1 %v450_v21 }
  0x36   :  { %1557 = vmatprep.subr.mxu1 %v545_v24  ;;  %v360_v24 = vrot.slane %v2143_v28, %v327_v40 }
  0xcc   :  { %v2156_v32 = vpop.f32.mrf.mxu1 }
  0xcd   :  { %v122_v41 = vrot.slane %v2156_v32, 1  ;;  %v138_v12 = vrot.slane %v2156_v32, 5  ;;  %v134_v21 = vrot.slane %v2156_v32, 4 }
  0xce   :  { %v2168_v39 = vpop.f32.mrf.mxu1 }
  0xcf   :  { %v123_v47 = vrot.slane %v2168_v39, 1  ;;  %v131_v52 = vrot.slane %v2168_v39, 3  ;;  %v127_v53 = vrot.slane %v2168_v39, 2  ;;  %v147_v17 = vrot.slane %v2168_v39, 7 }
  0xd6   :  { %v2173_v43 = vpop.f32.mrf.mxu1 }
  0xd7   :  { %v287_v48 = vsel %vm284_vm2, %v122_v41, %v2173_v43  ;;  %v252_v50 = vrot.slane %v2173_v43, 7  ;;  %v1446_v63 = vrot.slane %v2173_v43, 12  ;;  %v1444_v18 = vrot.slane %v2173_v43, 11 }
  0xd8   :  { %v2187_v51 = vpop.f32.mrf.mxu1  ;;  %v387_v57 = vadd.f32 %v316_v42, %v287_v48  ;;  %v1448_v41 = vrot.slane %v2173_v43, 13  ;;  %v543_v42 = vld [vmem:[%s2932_s4 + $0x3e8] sm:$0xff] }
  0xd9   :  { %v288_v56 = vsel %vm284_vm2, %v123_v47, %v2187_v51  ;;  %v253_v58 = vrot.slane %v2187_v51, 7  ;;  %v1443_v59 = vrot.slane %v2187_v51, 10  ;;  %v285_v61 = vsel %vm284_vm2, %v2156_v32, %v252_v50  ;;  %v496_v47 = vld [vmem:[%s2932_s4 + $0x270] sm:$0xff]  ;;  %v527_v48 = vld [vmem:[%s2932_s4 + $0x368] sm:$0xff] }
  0xda   :  { %v388_v60 = vadd.f32 %v320_v44, %v288_v56  ;;  %v1441_v62 = vrot.slane %v2187_v51, 9  ;;  %v385_v3 = vadd.f32 %v308_v46, %v285_v61  ;;  %v403_v9 = vmax.f32 %v387_v57, 0.0 }
  0xdb   :  { %v267_v0 = vrot.slane %v253_v58, 7  ;;  %v286_v1 = vsel %vm284_vm2, %v2168_v39, %v253_v58  ;;  %v292_v2 = vsel %vm284_vm2, %v131_v52, %v1443_v59  ;;  %v266_v19 = vrot.slane %v252_v50, 7  ;;  %v495_v58 = vld [vmem:[%s2932_s4 + $0x268] sm:$0xff]  ;;  %v526_v59 = vld [vmem:[%s2932_s4 + $0x360] sm:$0xff] }
  0xdc   :  { %v404_v4 = vmax.f32 %v388_v60, 0.0  ;;  %v386_v6 = vadd.f32 %v312_v45, %v286_v1  ;;  %v392_v7 = vadd.f32 %v336_v49, %v292_v2  ;;  %v290_v8 = vsel %vm284_vm2, %v127_v53, %v1441_v62 }
  0xdd   :  { %v390_v11 = vadd.f32 %v328_v54, %v290_v8  ;;  %v401_v25 = vmax.f32 %v385_v3, 0.0  ;;  %v295_v33 = vsel %vm284_vm2, %v138_v12, %v1446_v63  ;;  %v300_v38 = vsel %vm284_vm2, %v147_v17, %v267_v0  ;;  %v511_v54 = vld [vmem:[%s2932_s4 + $0x2e8] sm:$0xff]  ;;  %v510_v63 = vld [vmem:[%s2932_s4 + $0x2e0] sm:$0xff]  ;;  %v541_v0 = vld [vmem:[%s2932_s4 + $0x3d8] sm:$0xff] }
  0xde   :  { %824 = vmatprep.mubr.f32.mxu1 %v404_v4  ;;  %v402_v14 = vmax.f32 %v386_v6, 0.0  ;;  %v408_v16 = vmax.f32 %v392_v7, 0.0  ;;  %v2233_v44 = vadd.f32 %v348_v55, %v295_v33  ;;  %v2235_v45 = vadd.f32 %v368_v13, %v300_v38  ;;  %v542_v55 = vld [vmem:[%s2932_s4 + $0x3e0] sm:$0xff]  ;;  %v525_v3 = vld [vmem:[%s2932_s4 + $0x358] sm:$0xff]  ;;  %v524_v7 = vld [vmem:[%s2932_s4 + $0x350] sm:$0xff] }
  0xdf   :  { %825 = vmatmul.mubr.f32.vlgmr.msra.gmra.mxu1 %v403_v9  ;;  %v406_v40 = vmax.f32 %v390_v11, 0.0  ;;  %v146_v46 = vrot.slane %v2156_v32, 7  ;;  %v293_v49 = vsel %vm284_vm2, %v134_v21, %v1444_v18  ;;  %v143_v50 = vrot.slane %v2168_v39, 6  ;;  %v509_v4 = vld [vmem:[%s2932_s4 + $0x2d8] sm:$0xff]  ;;  %v508_v8 = vld [vmem:[%s2932_s4 + $0x2d0] sm:$0xff]  ;;  %v539_v9 = vld [vmem:[%s2932_s4 + $0x3c8] sm:$0xff] }
  0xe0   :  { %1558 = vmatpush3.msra.mxu1 %v529_v10  ;;  %754 = vmatprep.mubr.f32.mxu0 %v402_v14  ;;  %v1449_v52 = vrot.slane %v2187_v51, 13  ;;  %v142_v53 = vrot.slane %v2156_v32, 6  ;;  %v2254_v56 = vadd.f32 %v340_v22, %v293_v49  ;;  %v493_v6 = vld [vmem:[%s2932_s4 + $0x258] sm:$0xff]  ;;  %v492_v10 = vld [vmem:[%s2932_s4 + $0x250] sm:$0xff]  ;;  %v523_v11 = vld [vmem:[%s2932_s4 + $0x348] sm:$0xff]  ;;  %v130_v49 = vrot.slane %v2156_v32, 3 }
  0xe1   :  { %1559 = vmatprep.subr.mxu1 %v544_v15  ;;  %964 = vmatprep.mubr.f32.mxu1 %v408_v16  ;;  %v299_v57 = vsel %vm284_vm2, %v146_v46, %v266_v19  ;;  %v507_v12 = vld [vmem:[%s2932_s4 + $0x2c8] sm:$0xff]  ;;  %v538_v13 = vld [vmem:[%s2932_s4 + $0x3c0] sm:$0xff]  ;;  %v537_v17 = vld [vmem:[%s2932_s4 + $0x3b8] sm:$0xff] }
  0xe2   :  { %755 = vmatmul.mubr.f32.vlgmr.msra.gmra.mxu0 %v401_v25  ;;  %1560 = vmatpush3.msra.mxu1 %v528_v20  ;;  %v298_v60 = vsel %vm284_vm2, %v143_v50, %v1449_v52  ;;  %v2265_v61 = vadd.f32 %v2149_v30, %v299_v57  ;;  %v297_v62 = vsel %vm284_vm2, %v142_v53, %v1448_v41  ;;  %v494_v30 = vld [vmem:[%s2932_s4 + $0x260] sm:$0xff]  ;;  %v491_v14 = vld [vmem:[%s2932_s4 + $0x248] sm:$0xff]  ;;  %v521_v19 = vld [vmem:[%s2932_s4 + $0x338] sm:$0xff]  ;;  %v1447_v50 = vrot.slane %v2187_v51, 12 }
  0xe3   :  { %1523 = vmatpush3.msra.mxu0 %v497_v27  ;;  %894 = vmatprep.mubr.f32.mxu0 %v406_v40  ;;  %v2274_v1 = vadd.f32 %v360_v24, %v298_v60  ;;  %v2277_v2 = vadd.f32 %v2154_v31, %v297_v62  ;;  %v540_v31 = vld [vmem:[%s2932_s4 + $0x3d0] sm:$0xff]  ;;  %v522_v15 = vld [vmem:[%s2932_s4 + $0x340] sm:$0xff]  ;;  %v505_v20 = vld [vmem:[%s2932_s4 + $0x2b8] sm:$0xff]  ;;  %v1442_v40 = vrot.slane %v2173_v43, 10  ;;  %v139_v60 = vrot.slane %v2168_v39, 5 }
  0xe4   :  { %1524 = vmatprep.subr.mxu0 %v512_v37  ;;  %1561 = vmatprep.subr.mxu1 %v543_v42  ;;  %v506_v16 = vld [vmem:[%s2932_s4 + $0x2c0] sm:$0xff]  ;;  %v536_v21 = vld [vmem:[%s2932_s4 + $0x3b0] sm:$0xff]  ;;  %v489_v22 = vld [vmem:[%s2932_s4 + $0x238] sm:$0xff]  ;;  %v352_v62 = vrot.slane %v2143_v28, %v319_v35  ;;  %v324_v35 = vrot.slane %v2162_v34, %v323_v26 }
  0xe5   :  { %1525 = vmatpush3.msra.mxu0 %v496_v47  ;;  %1562 = vmatpush3.msra.mxu1 %v527_v48  ;;  %v490_v18 = vld [vmem:[%s2932_s4 + $0x240] sm:$0xff]  ;;  %v520_v24 = vld [vmem:[%s2932_s4 + $0x330] sm:$0xff]  ;;  %v535_v27 = vld [vmem:[%s2932_s4 + $0x3a8] sm:$0xff] }
  0xe6   :  { %1526 = vmatprep.subr.mxu0 %v511_v54  ;;  %1563 = vmatprep.subr.mxu1 %v542_v55  ;;  %v504_v25 = vld [vmem:[%s2932_s4 + $0x2b0] sm:$0xff]  ;;  %v519_v38 = vld [vmem:[%s2932_s4 + $0x328] sm:$0xff]  ;;  %v534_v37 = vld [vmem:[%s2932_s4 + $0x3a0] sm:$0xff]  ;;  %v332_v54 = vrot.slane %v2162_v34, %v331_v29  ;;  %v1440_v55 = vrot.slane %v2173_v43, 9 }
  0xe7   :  { %1527 = vmatpush3.msra.mxu0 %v495_v58  ;;  %1564 = vmatpush3.msra.mxu1 %v526_v59  ;;  %v488_v33 = vld [vmem:[%s2932_s4 + $0x230] sm:$0xff]  ;;  %v503_v41 = vld [vmem:[%s2932_s4 + $0x2a8] sm:$0xff]  ;;  %v518_v46 = vld [vmem:[%s2932_s4 + $0x320] sm:$0xff]  ;;  %v291_v59 = vsel %vm284_vm2, %v130_v49, %v1442_v40 }
  0xe8   :  { %1528 = vmatprep.subr.mxu0 %v510_v63  ;;  %1565 = vmatprep.subr.mxu1 %v541_v0  ;;  %v487_v42 = vld [vmem:[%s2932_s4 + $0x228] sm:$0xff]  ;;  %v502_v47 = vld [vmem:[%s2932_s4 + $0x2a0] sm:$0xff]  ;;  %v533_v48 = vld [vmem:[%s2932_s4 + $0x398] sm:$0xff]  ;;  %v126_v63 = vrot.slane %v2156_v32, 2  ;;  %v1445_v0 = vrot.slane %v2187_v51, 11 }
  0xe9   :  { %1529 = vmatpush3.msra.mxu0 %v494_v30  ;;  %1566 = vmatpush3.msra.mxu1 %v525_v3  ;;  %v486_v52 = vld [vmem:[%s2932_s4 + $0x220] sm:$0xff]  ;;  %v517_v53 = vld [vmem:[%s2932_s4 + $0x318] sm:$0xff]  ;;  %v532_v58 = vld [vmem:[%s2932_s4 + $0x390] sm:$0xff] }
  0xea   :  { %1530 = vmatprep.subr.mxu0 %v509_v4  ;;  %1567 = vmatprep.subr.mxu1 %v540_v31  ;;  %v501_v57 = vld [vmem:[%s2932_s4 + $0x298] sm:$0xff]  ;;  %v516_v43 = vld [vmem:[%s2932_s4 + $0x310] sm:$0xff]  ;;  %v531_v3 = vld [vmem:[%s2932_s4 + $0x388] sm:$0xff]  ;;  %v296_v4 = vsel %vm284_vm2, %v139_v60, %v1447_v50  ;;  %v391_v31 = vadd.f32 %v332_v54, %v291_v59 }
  0xeb   :  { %1531 = vmatpush3.msra.mxu0 %v493_v6  ;;  %1568 = vmatpush3.msra.mxu1 %v524_v7  ;;  %v485_v29 = vld [vmem:[%s2932_s4 + $0x218] sm:$0xff]  ;;  %v500_v30 = vld [vmem:[%s2932_s4 + $0x290] sm:$0xff]  ;;  %v515_v51 = vld [vmem:[%s2932_s4 + $0x308] sm:$0xff]  ;;  %v289_v6 = vsel %vm284_vm2, %v126_v63, %v1440_v55  ;;  %v135_v7 = vrot.slane %v2168_v39, 4 }
  0xec   :  { %1532 = vmatprep.subr.mxu0 %v508_v8  ;;  %1569 = vmatprep.subr.mxu1 %v539_v9  ;;  %v484_v32 = vld [vmem:[%s2932_s4 + $0x210] sm:$0xff]  ;;  %v499_v26 = vld [vmem:[%s2932_s4 + $0x288] sm:$0xff]  ;;  %v530_v34 = vld [vmem:[%s2932_s4 + $0x380] sm:$0xff]  ;;  %v344_v8 = vrot.slane %v2143_v28, %v311_v36  ;;  %v389_v28 = vadd.f32 %v324_v35, %v289_v6  ;;  %v407_v36 = vmax.f32 %v391_v31, 0.0 }
  0xed   :  { %1533 = vmatpush3.msra.mxu0 %v492_v10  ;;  %1570 = vmatpush3.msra.mxu1 %v523_v11  ;;  %v483_v39 = vld [vmem:[%s2932_s4 + $0x208] sm:$0xff]  ;;  %v514_v9 = vld [vmem:[%s2932_s4 + $0x300] sm:$0xff]  ;;  %v396_v10 = vadd.f32 %v352_v62, %v296_v4  ;;  %v294_v11 = vsel %vm284_vm2, %v135_v7, %v1445_v0  ;;  %v573_v49 = vld [vmem:[%s2932_s4 + $0x4d8] sm:$0xff] }
  0xee   :  { %1534 = vmatprep.subr.mxu0 %v507_v12  ;;  %1571 = vmatprep.subr.mxu1 %v538_v13  ;;  %v609_v12 = vld [vmem:[%s2932_s4 + $0x5f8] sm:$0xff]  ;;  %v482_v13 = vld [vmem:[%s2932_s4 + $0x200] sm:$0xff]  ;;  %v604_v50 = vld [vmem:[%s2932_s4 + $0x5d0] sm:$0xff] }
  0xef   :  { %1535 = vmatpush3.msra.mxu0 %v491_v14  ;;  %1572 = vmatpush3.msra.mxu1 %v522_v15  ;;  %v593_v14 = vld [vmem:[%s2932_s4 + $0x578] sm:$0xff]  ;;  %v394_v15 = vadd.f32 %v344_v8, %v294_v11  ;;  %v590_v40 = vld [vmem:[%s2932_s4 + $0x560] sm:$0xff]  ;;  %v572_v54 = vld [vmem:[%s2932_s4 + $0x4d0] sm:$0xff] }
  0xf0   :  { %1536 = vmatprep.subr.mxu0 %v506_v16  ;;  %1573 = vmatprep.subr.mxu1 %v537_v17  ;;  %v412_v16 = vmax.f32 %v396_v10, 0.0  ;;  %v577_v17 = vld [vmem:[%s2932_s4 + $0x4f8] sm:$0xff]  ;;  %v603_v55 = vld [vmem:[%s2932_s4 + $0x5c8] sm:$0xff]  ;;  %v602_v60 = vld [vmem:[%s2932_s4 + $0x5c0] sm:$0xff] }
  0xf1   :  { %1537 = vmatpush3.msra.mxu0 %v490_v18  ;;  %1574 = vmatpush3.msra.mxu1 %v521_v19  ;;  %v405_v18 = vmax.f32 %v389_v28, 0.0  ;;  %v608_v19 = vld [vmem:[%s2932_s4 + $0x5f0] sm:$0xff]  ;;  %v571_v59 = vld [vmem:[%s2932_s4 + $0x4c8] sm:$0xff]  ;;  %v570_v62 = vld [vmem:[%s2932_s4 + $0x4c0] sm:$0xff] }
  0xf2   :  { %1538 = vmatprep.subr.mxu0 %v505_v20  ;;  %1575 = vmatprep.subr.mxu1 %v536_v21  ;;  %v561_v20 = vld [vmem:[%s2932_s4 + $0x478] sm:$0xff]  ;;  %v592_v21 = vld [vmem:[%s2932_s4 + $0x570] sm:$0xff]  ;;  %v554_v0 = vld [vmem:[%s2932_s4 + $0x440] sm:$0xff] }
  0xf3   :  { %1539 = vmatpush3.msra.mxu0 %v489_v22  ;;  %1576 = vmatpush3.msra.mxu1 %v520_v24  ;;  %v410_v22 = vmax.f32 %v394_v15, 0.0  ;;  %v576_v24 = vld [vmem:[%s2932_s4 + $0x4f0] sm:$0xff]  ;;  %v601_v63 = vld [vmem:[%s2932_s4 + $0x5b8] sm:$0xff]  ;;  %v599_v31 = vld [vmem:[%s2932_s4 + $0x5a8] sm:$0xff] }
  0xf4   :  { %1540 = vmatprep.subr.mxu0 %v504_v25  ;;  %1577 = vmatprep.subr.mxu1 %v535_v27  ;;  %v607_v25 = vld [vmem:[%s2932_s4 + $0x5e8] sm:$0xff]  ;;  %v560_v27 = vld [vmem:[%s2932_s4 + $0x470] sm:$0xff]  ;;  %v553_v35 = vld [vmem:[%s2932_s4 + $0x438] sm:$0xff] }
  0xf5   :  { %1541 = vmatpush3.msra.mxu0 %v488_v33  ;;  %1578 = vmatpush3.msra.mxu1 %v519_v38  ;;  %v591_v33 = vld [vmem:[%s2932_s4 + $0x568] sm:$0xff]  ;;  %v600_v4 = vld [vmem:[%s2932_s4 + $0x5b0] sm:$0xff]  ;;  %v597_v10 = vld [vmem:[%s2932_s4 + $0x598] sm:$0xff] }
  0xf6   :  { %1542 = vmatprep.subr.mxu0 %v503_v41  ;;  %1579 = vmatprep.subr.mxu1 %v534_v37  ;;  %v575_v38 = vld [vmem:[%s2932_s4 + $0x4e8] sm:$0xff]  ;;  %v606_v41 = vld [vmem:[%s2932_s4 + $0x5e0] sm:$0xff]  ;;  %v552_v6 = vld [vmem:[%s2932_s4 + $0x430] sm:$0xff] }
  0xf7   :  { %1543 = vmatpush3.msra.mxu0 %v487_v42  ;;  %1580 = vmatpush3.msra.mxu1 %v518_v46  ;;  %v559_v37 = vld [vmem:[%s2932_s4 + $0x468] sm:$0xff]  ;;  %v574_v42 = vld [vmem:[%s2932_s4 + $0x4e0] sm:$0xff]  ;;  %v605_v46 = vld [vmem:[%s2932_s4 + $0x5d8] sm:$0xff] }
  0xf8   :  { %1544 = vmatprep.subr.mxu0 %v502_v47  ;;  %1581 = vmatprep.subr.mxu1 %v533_v48  ;;  %v558_v47 = vld [vmem:[%s2932_s4 + $0x460] sm:$0xff]  ;;  %v589_v48 = vld [vmem:[%s2932_s4 + $0x558] sm:$0xff]  ;;  %v583_v7 = vld [vmem:[%s2932_s4 + $0x528] sm:$0xff] }
  0xf9   :  { %1545 = vmatpush3.msra.mxu0 %v486_v52  ;;  %1582 = vmatpush3.msra.mxu1 %v517_v53  ;;  %v557_v52 = vld [vmem:[%s2932_s4 + $0x458] sm:$0xff]  ;;  %v588_v53 = vld [vmem:[%s2932_s4 + $0x550] sm:$0xff]  ;;  %v551_v8 = vld [vmem:[%s2932_s4 + $0x428] sm:$0xff] }
  0xfa   :  { %1546 = vmatprep.subr.mxu0 %v501_v57  ;;  %1583 = vmatprep.subr.mxu1 %v532_v58  ;;  %v556_v57 = vld [vmem:[%s2932_s4 + $0x450] sm:$0xff]  ;;  %v587_v58 = vld [vmem:[%s2932_s4 + $0x548] sm:$0xff]  ;;  %v550_v11 = vld [vmem:[%s2932_s4 + $0x420] sm:$0xff] }
  0xfb   :  { %1547 = vmatpush3.msra.mxu0 %v485_v29  ;;  %1584 = vmatpush3.msra.mxu1 %v516_v43  ;;  %v555_v29 = vld [vmem:[%s2932_s4 + $0x448] sm:$0xff]  ;;  %v586_v43 = vld [vmem:[%s2932_s4 + $0x540] sm:$0xff]  ;;  %v565_v28 = vld [vmem:[%s2932_s4 + $0x498] sm:$0xff] }
  0xfc   :  { %1548 = vmatprep.subr.mxu0 %v500_v30  ;;  %1585 = vmatprep.subr.mxu1 %v531_v3  ;;  %v585_v30 = vld [vmem:[%s2932_s4 + $0x538] sm:$0xff]  ;;  %v595_v15 = vld [vmem:[%s2932_s4 + $0x588] sm:$0xff] }
  0xfd   :  { %1549 = vmatpush3.msra.mxu0 %v484_v32  ;;  %1586 = vmatpush3.msra.mxu1 %v515_v51  ;;  %v569_v3 = vld [vmem:[%s2932_s4 + $0x4b8] sm:$0xff]  ;;  %v584_v32 = vld [vmem:[%s2932_s4 + $0x530] sm:$0xff] }
  0xfe   :  { %1550 = vmatprep.subr.mxu0 %v499_v26  ;;  %1587 = vmatprep.subr.mxu1 %v530_v34  ;;  %v568_v51 = vld [vmem:[%s2932_s4 + $0x4b0] sm:$0xff]  ;;  %v567_v26 = vld [vmem:[%s2932_s4 + $0x4a8] sm:$0xff]  ;;  %v598_v34 = vld [vmem:[%s2932_s4 + $0x5a0] sm:$0xff] }
  0xff   :  { %1551 = vmatpush3.msra.mxu0 %v483_v39  ;;  %1588 = vmatpush3.msra.mxu1 %v514_v9  ;;  %v582_v39 = vld [vmem:[%s2932_s4 + $0x520] sm:$0xff] }
 0x100   :  { %1552 = vmatprep.subr.mxu0 %v498_v23  ;;  %965 = vmatmul.mubr.f32.vlgmr.msra.gmra.mxu1 %v407_v36  ;;  %v566_v9 = vld [vmem:[%s2932_s4 + $0x4a0] sm:$0xff]  ;;  %v581_v23 = vld [vmem:[%s2932_s4 + $0x518] sm:$0xff]  ;;  %v596_v36 = vld [vmem:[%s2932_s4 + $0x590] sm:$0xff] }
 0x101   :  { %1627 = vmatprep.subr.mxu1 %v609_v12  ;;  %1553 = vmatpush3.msra.mxu0 %v482_v13  ;;  %v549_v12 = vld [vmem:[%s2932_s4 + $0x418] sm:$0xff]  ;;  %v580_v13 = vld [vmem:[%s2932_s4 + $0x510] sm:$0xff] }
 0x102   :  { %1628 = vmatpush3.msra.mxu1 %v593_v14  ;;  %1104 = vmatprep.mubr.f32.mxu1 %v412_v16  ;;  %v564_v14 = vld [vmem:[%s2932_s4 + $0x490] sm:$0xff] }
 0x103   :  { %895 = vmatmul.mubr.f32.vlgmr.msra.gmra.mxu0 %v405_v18  ;;  %1592 = vmatprep.subr.mxu0 %v577_v17  ;;  %v548_v16 = vld [vmem:[%s2932_s4 + $0x410] sm:$0xff]  ;;  %v579_v17 = vld [vmem:[%s2932_s4 + $0x508] sm:$0xff] }
 0x104   :  { %1629 = vmatprep.subr.mxu1 %v608_v19  ;;  %1593 = vmatpush3.msra.mxu0 %v561_v20  ;;  %v563_v18 = vld [vmem:[%s2932_s4 + $0x488] sm:$0xff]  ;;  %v594_v19 = vld [vmem:[%s2932_s4 + $0x580] sm:$0xff] }
 0x105   :  { %1034 = vmatprep.mubr.f32.mxu0 %v410_v22  ;;  %1630 = vmatpush3.msra.mxu1 %v592_v21  ;;  %v547_v20 = vld [vmem:[%s2932_s4 + $0x408] sm:$0xff]  ;;  %v578_v21 = vld [vmem:[%s2932_s4 + $0x500] sm:$0xff] }
 0x106   :  { %1594 = vmatprep.subr.mxu0 %v576_v24  ;;  %1631 = vmatprep.subr.mxu1 %v607_v25  ;;  %v562_v22 = vld [vmem:[%s2932_s4 + $0x480] sm:$0xff]  ;;  %v411_v24 = vmax.f32 %v2233_v44, 0.0  ;;  %v673_v25 = vld [vmem:[%s2932_s4 + $0x7f8] sm:$0xff] }
 0x107   :  { %1595 = vmatpush3.msra.mxu0 %v560_v27  ;;  %1632 = vmatpush3.msra.mxu1 %v591_v33  ;;  %v546_v27 = vld [vmem:[%s2932_s4 + $0x400] sm:$0xff]  ;;  %v657_v33 = vld [vmem:[%s2932_s4 + $0x778] sm:$0xff] }
 0x108   :  { %1596 = vmatprep.subr.mxu0 %v575_v38  ;;  %1633 = vmatprep.subr.mxu1 %v606_v41  ;;  %v416_v38 = vmax.f32 %v2235_v45, 0.0  ;;  %v641_v44 = vld [vmem:[%s2932_s4 + $0x6f8] sm:$0xff]  ;;  %v409_v41 = vmax.f32 %v2254_v56, 0.0  ;;  %v656_v45 = vld [vmem:[%s2932_s4 + $0x770] sm:$0xff] }
 0x109   :  { %1597 = vmatpush3.msra.mxu0 %v559_v37  ;;  %1634 = vmatpush3.msra.mxu1 %v590_v40  ;;  %v672_v37 = vld [vmem:[%s2932_s4 + $0x7f0] sm:$0xff]  ;;  %v625_v40 = vld [vmem:[%s2932_s4 + $0x678] sm:$0xff] }
 0x10a   :  { %1598 = vmatprep.subr.mxu0 %v574_v42  ;;  %1635 = vmatprep.subr.mxu1 %v605_v46  ;;  %v414_v42 = vmax.f32 %v2274_v1, 0.0  ;;  %v640_v56 = vld [vmem:[%s2932_s4 + $0x6f0] sm:$0xff]  ;;  %v671_v46 = vld [vmem:[%s2932_s4 + $0x7e8] sm:$0xff] }
 0x10b   :  { %1599 = vmatpush3.msra.mxu0 %v558_v47  ;;  %1636 = vmatpush3.msra.mxu1 %v589_v48  ;;  %v624_v47 = vld [vmem:[%s2932_s4 + $0x670] sm:$0xff]  ;;  %v655_v48 = vld [vmem:[%s2932_s4 + $0x768] sm:$0xff] }
 0x10c   :  { %1600 = vmatprep.subr.mxu0 %v573_v49  ;;  %1637 = vmatprep.subr.mxu1 %v604_v50  ;;  %v639_v1 = vld [vmem:[%s2932_s4 + $0x6e8] sm:$0xff]  ;;  %v670_v49 = vld [vmem:[%s2932_s4 + $0x7e0] sm:$0xff] }
 0x10d   :  { %1601 = vmatpush3.msra.mxu0 %v557_v52  ;;  %1638 = vmatpush3.msra.mxu1 %v588_v53  ;;  %v623_v50 = vld [vmem:[%s2932_s4 + $0x668] sm:$0xff]  ;;  %v654_v52 = vld [vmem:[%s2932_s4 + $0x760] sm:$0xff] }
 0x10e   :  { %1602 = vmatprep.subr.mxu0 %v572_v54  ;;  %1639 = vmatprep.subr.mxu1 %v603_v55  ;;  %v638_v53 = vld [vmem:[%s2932_s4 + $0x6e0] sm:$0xff]  ;;  %v669_v54 = vld [vmem:[%s2932_s4 + $0x7d8] sm:$0xff] }
 0x10f   :  { %1603 = vmatpush3.msra.mxu0 %v556_v57  ;;  %1640 = vmatpush3.msra.mxu1 %v587_v58  ;;  %v622_v55 = vld [vmem:[%s2932_s4 + $0x660] sm:$0xff]  ;;  %v653_v57 = vld [vmem:[%s2932_s4 + $0x758] sm:$0xff] }
 0x110   :  { %1604 = vmatprep.subr.mxu0 %v571_v59  ;;  %1641 = vmatprep.subr.mxu1 %v602_v60  ;;  %v637_v58 = vld [vmem:[%s2932_s4 + $0x6d8] sm:$0xff]  ;;  %v668_v59 = vld [vmem:[%s2932_s4 + $0x7d0] sm:$0xff] }
 0x111   :  { %1605 = vmatpush3.msra.mxu0 %v555_v29  ;;  %1642 = vmatpush3.msra.mxu1 %v586_v43  ;;  %v621_v60 = vld [vmem:[%s2932_s4 + $0x658] sm:$0xff]  ;;  %v652_v29 = vld [vmem:[%s2932_s4 + $0x750] sm:$0xff] }
 0x112   :  { %1606 = vmatprep.subr.mxu0 %v570_v62  ;;  %1643 = vmatprep.subr.mxu1 %v601_v63  ;;  %v636_v43 = vld [vmem:[%s2932_s4 + $0x6d0] sm:$0xff]  ;;  %v667_v62 = vld [vmem:[%s2932_s4 + $0x7c8] sm:$0xff] }
 0x113   :  { %1607 = vmatpush3.msra.mxu0 %v554_v0  ;;  %1644 = vmatpush3.msra.mxu1 %v585_v30  ;;  %v620_v63 = vld [vmem:[%s2932_s4 + $0x650] sm:$0xff]  ;;  %v651_v0 = vld [vmem:[%s2932_s4 + $0x748] sm:$0xff] }
 0x114   :  { %1608 = vmatprep.subr.mxu0 %v569_v3  ;;  %1645 = vmatprep.subr.mxu1 %v600_v4  ;;  %v635_v30 = vld [vmem:[%s2932_s4 + $0x6c8] sm:$0xff]  ;;  %v666_v3 = vld [vmem:[%s2932_s4 + $0x7c0] sm:$0xff] }
 0x115   :  { %1609 = vmatpush3.msra.mxu0 %v553_v35  ;;  %1646 = vmatpush3.msra.mxu1 %v584_v32  ;;  %v619_v4 = vld [vmem:[%s2932_s4 + $0x648] sm:$0xff]  ;;  %v650_v35 = vld [vmem:[%s2932_s4 + $0x740] sm:$0xff] }
 0x116   :  { %1610 = vmatprep.subr.mxu0 %v568_v51  ;;  %1647 = vmatprep.subr.mxu1 %v599_v31  ;;  %v634_v32 = vld [vmem:[%s2932_s4 + $0x6c0] sm:$0xff]  ;;  %v665_v51 = vld [vmem:[%s2932_s4 + $0x7b8] sm:$0xff] }
 0x117   :  { %1611 = vmatpush3.msra.mxu0 %v552_v6  ;;  %1648 = vmatpush3.msra.mxu1 %v583_v7  ;;  %v618_v31 = vld [vmem:[%s2932_s4 + $0x640] sm:$0xff]  ;;  %v649_v6 = vld [vmem:[%s2932_s4 + $0x738] sm:$0xff] }
 0x118   :  { %1612 = vmatprep.subr.mxu0 %v567_v26  ;;  %1649 = vmatprep.subr.mxu1 %v598_v34  ;;  %v633_v7 = vld [vmem:[%s2932_s4 + $0x6b8] sm:$0xff]  ;;  %v664_v26 = vld [vmem:[%s2932_s4 + $0x7b0] sm:$0xff] }
 0x119   :  { %1613 = vmatpush3.msra.mxu0 %v551_v8  ;;  %1650 = vmatpush3.msra.mxu1 %v582_v39  ;;  %v617_v34 = vld [vmem:[%s2932_s4 + $0x638] sm:$0xff]  ;;  %v648_v8 = vld [vmem:[%s2932_s4 + $0x730] sm:$0xff] }
 0x11a   :  { %1614 = vmatprep.subr.mxu0 %v566_v9  ;;  %1651 = vmatprep.subr.mxu1 %v597_v10  ;;  %v632_v39 = vld [vmem:[%s2932_s4 + $0x6b0] sm:$0xff]  ;;  %v663_v9 = vld [vmem:[%s2932_s4 + $0x7a8] sm:$0xff] }
 0x11b   :  { %1615 = vmatpush3.msra.mxu0 %v550_v11  ;;  %1652 = vmatpush3.msra.mxu1 %v581_v23  ;;  %v616_v10 = vld [vmem:[%s2932_s4 + $0x630] sm:$0xff]  ;;  %v647_v11 = vld [vmem:[%s2932_s4 + $0x728] sm:$0xff] }
 0x11c   :  { %1616 = vmatprep.subr.mxu0 %v565_v28  ;;  %1653 = vmatprep.subr.mxu1 %v596_v36  ;;  %v631_v23 = vld [vmem:[%s2932_s4 + $0x6a8] sm:$0xff]  ;;  %v662_v28 = vld [vmem:[%s2932_s4 + $0x7a0] sm:$0xff] }
 0x11d   :  { %1617 = vmatpush3.msra.mxu0 %v549_v12  ;;  %1654 = vmatpush3.msra.mxu1 %v580_v13  ;;  %v615_v36 = vld [vmem:[%s2932_s4 + $0x628] sm:$0xff]  ;;  %v646_v12 = vld [vmem:[%s2932_s4 + $0x720] sm:$0xff] }
 0x11e   :  { %1618 = vmatprep.subr.mxu0 %v564_v14  ;;  %1655 = vmatprep.subr.mxu1 %v595_v15  ;;  %v630_v13 = vld [vmem:[%s2932_s4 + $0x6a0] sm:$0xff]  ;;  %v661_v14 = vld [vmem:[%s2932_s4 + $0x798] sm:$0xff] }
 0x11f   :  { %1619 = vmatpush3.msra.mxu0 %v548_v16  ;;  %1656 = vmatpush3.msra.mxu1 %v579_v17  ;;  %v614_v15 = vld [vmem:[%s2932_s4 + $0x620] sm:$0xff]  ;;  %v645_v16 = vld [vmem:[%s2932_s4 + $0x718] sm:$0xff] }
 0x120   :  { %1620 = vmatprep.subr.mxu0 %v563_v18  ;;  %1657 = vmatprep.subr.mxu1 %v594_v19  ;;  %v629_v17 = vld [vmem:[%s2932_s4 + $0x698] sm:$0xff]  ;;  %v660_v18 = vld [vmem:[%s2932_s4 + $0x790] sm:$0xff] }
 0x121   :  { %1621 = vmatpush3.msra.mxu0 %v547_v20  ;;  %1658 = vmatpush3.msra.mxu1 %v578_v21  ;;  %v613_v19 = vld [vmem:[%s2932_s4 + $0x618] sm:$0xff]  ;;  %v644_v20 = vld [vmem:[%s2932_s4 + $0x710] sm:$0xff] }
 0x122   :  { %1622 = vmatprep.subr.mxu0 %v562_v22  ;;  %1105 = vmatmul.mubr.f32.vlgmr.msra.gmra.mxu1 %v411_v24  ;;  %v628_v21 = vld [vmem:[%s2932_s4 + $0x690] sm:$0xff]  ;;  %v659_v22 = vld [vmem:[%s2932_s4 + $0x788] sm:$0xff] }
 0x123   :  { %1697 = vmatprep.subr.mxu1 %v673_v25  ;;  %1623 = vmatpush3.msra.mxu0 %v546_v27  ;;  %v612_v24 = vld [vmem:[%s2932_s4 + $0x610] sm:$0xff]  ;;  %v643_v25 = vld [vmem:[%s2932_s4 + $0x708] sm:$0xff] }
 0x124   :  { %1698 = vmatpush3.msra.mxu1 %v657_v33  ;;  %1244 = vmatprep.mubr.f32.mxu1 %v416_v38  ;;  %v627_v27 = vld [vmem:[%s2932_s4 + $0x688] sm:$0xff]  ;;  %v658_v33 = vld [vmem:[%s2932_s4 + $0x780] sm:$0xff] }
 0x125   :  { %1035 = vmatmul.mubr.f32.vlgmr.msra.gmra.mxu0 %v409_v41  ;;  %1662 = vmatprep.subr.mxu0 %v641_v44  ;;  %v611_v38 = vld [vmem:[%s2932_s4 + $0x608] sm:$0xff]  ;;  %v642_v44 = vld [vmem:[%s2932_s4 + $0x700] sm:$0xff] }
 0x126   :  { %1699 = vmatprep.subr.mxu1 %v672_v37  ;;  %1663 = vmatpush3.msra.mxu0 %v625_v40  ;;  %v626_v41 = vld [vmem:[%s2932_s4 + $0x680] sm:$0xff]  ;;  %v415_v37 = vmax.f32 %v2265_v61, 0.0  ;;  %v688_v61 = vld [vmem:[%s2932_s4 + $0x870] sm:$0xff] }
 0x127   :  { %1174 = vmatprep.mubr.f32.mxu0 %v414_v42  ;;  %1700 = vmatpush3.msra.mxu1 %v656_v45  ;;  %v610_v40 = vld [vmem:[%s2932_s4 + $0x600] sm:$0xff]  ;;  %v413_v45 = vmax.f32 %v2277_v2, 0.0  ;;  %v689_v42 = vld [vmem:[%s2932_s4 + $0x878] sm:$0xff]  ;;  %v687_v2 = vld [vmem:[%s2932_s4 + $0x868] sm:$0xff] }
 0x128   :  { %1664 = vmatprep.subr.mxu0 %v640_v56  ;;  %1701 = vmatprep.subr.mxu1 %v671_v46  ;;  %v686_v56 = vld [vmem:[%s2932_s4 + $0x860] sm:$0xff]  ;;  %v685_v46 = vld [vmem:[%s2932_s4 + $0x858] sm:$0xff] }
 0x129   :  { %1665 = vmatpush3.msra.mxu0 %v624_v47  ;;  %1702 = vmatpush3.msra.mxu1 %v655_v48  ;;  %v684_v47 = vld [vmem:[%s2932_s4 + $0x850] sm:$0xff]  ;;  %v683_v48 = vld [vmem:[%s2932_s4 + $0x848] sm:$0xff] }
 0x12a   :  { %1666 = vmatprep.subr.mxu0 %v639_v1  ;;  %1703 = vmatprep.subr.mxu1 %v670_v49  ;;  %v682_v1 = vld [vmem:[%s2932_s4 + $0x840] sm:$0xff]  ;;  %v681_v49 = vld [vmem:[%s2932_s4 + $0x838] sm:$0xff] }
 0x12b   :  { %1667 = vmatpush3.msra.mxu0 %v623_v50  ;;  %1704 = vmatpush3.msra.mxu1 %v654_v52  ;;  %v680_v50 = vld [vmem:[%s2932_s4 + $0x830] sm:$0xff]  ;;  %v679_v52 = vld [vmem:[%s2932_s4 + $0x828] sm:$0xff] }
 0x12c   :  { %1668 = vmatprep.subr.mxu0 %v638_v53  ;;  %1705 = vmatprep.subr.mxu1 %v669_v54  ;;  %v678_v53 = vld [vmem:[%s2932_s4 + $0x820] sm:$0xff]  ;;  %v677_v54 = vld [vmem:[%s2932_s4 + $0x818] sm:$0xff] }
 0x12d   :  { %1669 = vmatpush3.msra.mxu0 %v622_v55  ;;  %1706 = vmatpush3.msra.mxu1 %v653_v57  ;;  %v676_v55 = vld [vmem:[%s2932_s4 + $0x810] sm:$0xff]  ;;  %v675_v57 = vld [vmem:[%s2932_s4 + $0x808] sm:$0xff] }
 0x12e   :  { %1670 = vmatprep.subr.mxu0 %v637_v58  ;;  %1707 = vmatprep.subr.mxu1 %v668_v59  ;;  %v674_v58 = vld [vmem:[%s2932_s4 + $0x800] sm:$0xff] }
 0x12f   :  { %1671 = vmatpush3.msra.mxu0 %v621_v60  ;;  %1708 = vmatpush3.msra.mxu1 %v652_v29  ;;  %v417_v59 = vld [vmem:[%s2929_s1] sm:$0x3]  ;;  %v1324_v60 = vld [vmem:[%s2933_s5 + $0x18] sm:$0xff]  ;;  %v1323_v29 = vld [vmem:[%s2933_s5 + $0x10] sm:$0xff] }
 0x130   :  { %1672 = vmatprep.subr.mxu0 %v636_v43  ;;  %1709 = vmatprep.subr.mxu1 %v667_v62  ;;  %v1322_v43 = vld [vmem:[%s2933_s5 + $0x8] sm:$0xff]  ;;  %v1321_v62 = vld [vmem:[%s2933_s5] sm:$0xff] }
 0x131   :  { %1673 = vmatpush3.msra.mxu0 %v620_v63  ;;  %1710 = vmatpush3.msra.mxu1 %v651_v0 }
 0x132   :  { %1674 = vmatprep.subr.mxu0 %v635_v30  ;;  %1711 = vmatprep.subr.mxu1 %v666_v3 }
 0x133   :  { %1675 = vmatpush3.msra.mxu0 %v619_v4  ;;  %1712 = vmatpush3.msra.mxu1 %v650_v35 }
 0x134   :  { %1676 = vmatprep.subr.mxu0 %v634_v32  ;;  %1713 = vmatprep.subr.mxu1 %v665_v51 }
 0x135   :  { %1677 = vmatpush3.msra.mxu0 %v618_v31  ;;  %1714 = vmatpush3.msra.mxu1 %v649_v6 }
 0x136   :  { %1678 = vmatprep.subr.mxu0 %v633_v7  ;;  %1715 = vmatprep.subr.mxu1 %v664_v26 }
 0x137   :  { %1679 = vmatpush3.msra.mxu0 %v617_v34  ;;  %1716 = vmatpush3.msra.mxu1 %v648_v8 }
 0x138   :  { %1680 = vmatprep.subr.mxu0 %v632_v39  ;;  %1717 = vmatprep.subr.mxu1 %v663_v9 }
 0x139   :  { %1681 = vmatpush3.msra.mxu0 %v616_v10  ;;  %1718 = vmatpush3.msra.mxu1 %v647_v11 }
 0x13a   :  { %1682 = vmatprep.subr.mxu0 %v631_v23  ;;  %1719 = vmatprep.subr.mxu1 %v662_v28 }
 0x13b   :  { %1683 = vmatpush3.msra.mxu0 %v615_v36  ;;  %1720 = vmatpush3.msra.mxu1 %v646_v12 }
 0x13c   :  { %1684 = vmatprep.subr.mxu0 %v630_v13  ;;  %1721 = vmatprep.subr.mxu1 %v661_v14 }
 0x13d   :  { %1685 = vmatpush3.msra.mxu0 %v614_v15  ;;  %1722 = vmatpush3.msra.mxu1 %v645_v16 }
 0x13e   :  { %1686 = vmatprep.subr.mxu0 %v629_v17  ;;  %1723 = vmatprep.subr.mxu1 %v660_v18 }
 0x13f   :  { %1687 = vmatpush3.msra.mxu0 %v613_v19  ;;  %1724 = vmatpush3.msra.mxu1 %v644_v20 }
 0x140   :  { %1688 = vmatprep.subr.mxu0 %v628_v21  ;;  %1725 = vmatprep.subr.mxu1 %v659_v22 }
 0x141   :  { %1689 = vmatpush3.msra.mxu0 %v612_v24  ;;  %1726 = vmatpush3.msra.mxu1 %v643_v25 }
 0x142   :  { %1690 = vmatprep.subr.mxu0 %v627_v27  ;;  %1727 = vmatprep.subr.mxu1 %v658_v33  ;;  %v1450_v27 = vld [vmem:[%s2934_s6] ss:$0 sm:$0xff] }
 0x143   :  { %1691 = vmatpush3.msra.mxu0 %v611_v38  ;;  %1728 = vmatpush3.msra.mxu1 %v642_v44 }
 0x144   :  { %1692 = vmatprep.subr.mxu0 %v626_v41  ;;  %1245 = vmatmul.mubr.f32.vlgmr.msra.gmra.mxu1 %v415_v37 }
 0x145   :  { %1693 = vmatpush3.msra.mxu0 %v610_v40  ;;  %1789 = vmatprep.subr.mxu1 %v1825_v5 }
 0x146   :  { %1175 = vmatmul.mubr.f32.vlgmr.msra.gmra.mxu0 %v413_v45  ;;  %1754 = vmatprep.subr.mxu0 %v1825_v5 }
 0x147   :  { %1755 = vmatpush3.msra.mxu0 %v689_v42  ;;  %1786 = vmatprep.mubr.msk.f32.mxu0 %vm1826_vm3, %v1825_v5 }
 0x148   :  { %1756 = vmatprep.subr.mxu0 %v1825_v5  ;;  %1797 = vmatprep.mubr.msk.f32.mxu1 %vm1826_vm3, %v1825_v5 }
 0x149   :  { %1757 = vmatpush3.msra.mxu0 %v688_v61  ;;  %1790 = vmatpush3.msra.mxu1 %v1324_v60 }
 0x14a   :  { %1758 = vmatprep.subr.mxu0 %v1825_v5  ;;  %1791 = vmatprep.subr.mxu1 %v1825_v5 }
 0x14b   :  { %1759 = vmatpush3.msra.mxu0 %v687_v2  ;;  %1792 = vmatpush3.msra.mxu1 %v1323_v29 }
 0x14c   :  { %1760 = vmatprep.subr.mxu0 %v1825_v5  ;;  %1793 = vmatprep.subr.mxu1 %v1825_v5 }
 0x14d   :  { %1761 = vmatpush3.msra.mxu0 %v686_v56  ;;  %1794 = vmatpush3.msra.mxu1 %v1322_v43 }
 0x14e   :  { %1762 = vmatprep.subr.mxu0 %v1825_v5  ;;  %1795 = vmatprep.subr.mxu1 %v1825_v5 }
 0x14f   :  { %1763 = vmatpush3.msra.mxu0 %v685_v46  ;;  %1796 = vmatpush3.msra.mxu1 %v1321_v62 }
 0x150   :  { %1764 = vmatprep.subr.mxu0 %v1825_v5 }
 0x151   :  { %1765 = vmatpush3.msra.mxu0 %v684_v47 }
 0x152   :  { %1766 = vmatprep.subr.mxu0 %v1825_v5 }
 0x153   :  { %1767 = vmatpush3.msra.mxu0 %v683_v48 }
 0x154   :  { %1768 = vmatprep.subr.mxu0 %v1825_v5 }
 0x155   :  { %1769 = vmatpush3.msra.mxu0 %v682_v1 }
 0x156   :  { %1770 = vmatprep.subr.mxu0 %v1825_v5 }
 0x157   :  { %1771 = vmatpush3.msra.mxu0 %v681_v49 }
 0x158   :  { %1772 = vmatprep.subr.mxu0 %v1825_v5 }
 0x159   :  { %1773 = vmatpush3.msra.mxu0 %v680_v50 }
 0x15a   :  { %1774 = vmatprep.subr.mxu0 %v1825_v5 }
 0x15b   :  { %1775 = vmatpush3.msra.mxu0 %v679_v52 }
 0x15c   :  { %1776 = vmatprep.subr.mxu0 %v1825_v5 }
 0x15d   :  { %1777 = vmatpush3.msra.mxu0 %v678_v53 }
 0x15e   :  { %1778 = vmatprep.subr.mxu0 %v1825_v5 }
 0x15f   :  { %1779 = vmatpush3.msra.mxu0 %v677_v54 }
 0x160   :  { %1780 = vmatprep.subr.mxu0 %v1825_v5 }
 0x161   :  { %1781 = vmatpush3.msra.mxu0 %v676_v55 }
 0x162   :  { %1782 = vmatprep.subr.mxu0 %v1825_v5 }
 0x163   :  { %1783 = vmatpush3.msra.mxu0 %v675_v57 }
 0x164   :  { %1784 = vmatprep.subr.mxu0 %v1825_v5 }
 0x165   :  { %1785 = vmatpush3.msra.mxu0 %v674_v58 }
 0x166   :  { %1787 = vmatmul.mubr.f32.vlgmr.msra.gmra.mxu0 %v417_v59 }
 0x19f   :  { %v1519_v30 = vpop.f32.mrf.mxu1 }
 0x1a1   :  { %v1520_v4 = vpop.f32.mrf.mxu1 }
 0x1a2   :  { %v1484_v63 = vpop.f32.mrf.mxu0  ;;  %v1521_v6 = vadd.f32 %v1520_v4, %v1519_v30 }
 0x1a4   :  { %v1485_v0 = vpop.f32.mrf.mxu0 }
 0x1a5   :  { %v1486_v32 = vadd.f32 %v1485_v0, %v1484_v63 }
 0x1a7   :  { %v827_v26 = vadd.f32 %v1521_v6, %v1486_v32 }
 0x1c0   :  { %v1589_v51 = vpop.f32.mrf.mxu1 }
 0x1c2   :  { %v1590_v34 = vpop.f32.mrf.mxu1 }
 0x1c3   :  { %v1554_v3 = vpop.f32.mrf.mxu0  ;;  %v1591_v11 = vadd.f32 %v1590_v34, %v1589_v51 }
 0x1c5   :  { %v1555_v35 = vpop.f32.mrf.mxu0 }
 0x1c6   :  { %v1556_v7 = vadd.f32 %v1555_v35, %v1554_v3 }
 0x1c8   :  { %v897_v39 = vadd.f32 %v1556_v7, %v827_v26 }
 0x1ca   :  { %v967_v23 = vadd.f32 %v1591_v11, %v897_v39 }
 0x1e2   :  { %v1659_v9 = vpop.f32.mrf.mxu1 }
 0x1e4   :  { %v1660_v28 = vpop.f32.mrf.mxu1 }
 0x1e5   :  { %v1624_v31 = vpop.f32.mrf.mxu0  ;;  %v1661_v14 = vadd.f32 %v1660_v28, %v1659_v9 }
 0x1e7   :  { %v1625_v8 = vpop.f32.mrf.mxu0 }
 0x1e8   :  { %v1626_v5 = vadd.f32 %v1625_v8, %v1624_v31 }
 0x1ea   :  { %v1037_v12 = vadd.f32 %v1626_v5, %v967_v23 }
 0x1ec   :  { %v1107_v16 = vadd.f32 %v1661_v14, %v1037_v12 }
 0x204   :  { %v1729_v13 = vpop.f32.mrf.mxu1 }
 0x206   :  { %v1694_v10 = vpop.f32.mrf.mxu0  ;;  %v1730_v17 = vpop.f32.mrf.mxu1 }
 0x207   :  { %v1731_v19 = vadd.f32 %v1730_v17, %v1729_v13 }
 0x208   :  { %v1695_v36 = vpop.f32.mrf.mxu0 }
 0x209   :  { %v1696_v15 = vadd.f32 %v1695_v36, %v1694_v10 }
 0x20b   :  { %v1177_v18 = vadd.f32 %v1696_v15, %v1107_v16 }
 0x20d   :  { %v1247_v20 = vadd.f32 %v1731_v19, %v1177_v18 }
 0x226   :  { %v1316_v21 = vpop.f32.mrf.mxu0 }
 0x227   :  { %v1317_v22 = vadd.f32 %v1316_v21, %v1247_v20 }
 0x228   :  { %v1788_v24 = vpop.f32.mrf.mxu0 }
 0x229   :  { %v1320_v25 = vmax.f32 %v1317_v22, 0.0 }
 0x22b   :  { %1798 = vmatmul.mubr.msk.f32.vlgmr.msra.gmra.mxu1 %vm1332_vm4, %v1320_v25 }
 0x2eb   :  { %v1402_v33 = vpop.f32.mrf.mxu1 }
 0x2ec   :  { %v1403_v38 = vadd.f32 %v1450_v27, %v1402_v33 }
 0x2ed   :  { %v1799_v44 = vpop.f32.mrf.mxu1 }
 0x2ee   :  { %1407 = vst.msk [vmem:[#allocation2] sm:$0x3] %vm1406_vm5, %v1403_v38 }
 0x2ef   :  { %1814 = shalt.err (!%p1811_p4)
}
 0x2f0   :  { %1417 = dma.vmem_to_hbm [thread:$0]  %s1415_s11, 32, %s2935_s7, [#allocation3]  }
 0x2f1   :  { %1823 = dma.done.wait [#allocation3], 32  }
 0x2f2   :  { %1824 = vsyncadd [#allocation3], 4294967264 }
 0x2f3   :  { %1421 = vsyncpa [#allocation3], 1 }

</bundles_post_ra>
